<compile_context>
chip_gen: v7x
topology: tpu7x:2x2x1
jax: 0.10.0
libtpu: 0.0.40
codegen_flags: <defaults>
</compile_context>

<pallas_src>
import jax
import jax.numpy as jnp
from jax.experimental import pallas as pl
from jax.experimental.pallas import tpu as pltpu

VOCAB = 1500
EMB = 4
LANE = 128


def _round_up(x, m):
    return (x + m - 1) // m * m


# ---------------------------------------------------------------------------
# Kernel 1 (one-off): relu_scores[v] = relu(sum_e table[v, e] * w[e] + b)
# The table is passed TRANSPOSED + lane-padded as (EMB, V_PAD) so the score row
# is lane-dense (V on the 128-lane axis) and the "matmul" is 4 VPU
# multiply-adds instead of a degenerate MXU op.  w and b live in SMEM.
# ---------------------------------------------------------------------------
def _scores_kernel(table_t_ref, w_ref, b_ref, scores_ref):
    tt = table_t_ref[...]                              # (EMB, V_PAD) f32 in VMEM
    acc = tt[0:1, :] * w_ref[0]                        # (1, V_PAD)
    for e in range(1, EMB):                            # EMB == 4, static unroll
        acc = acc + tt[e:e + 1, :] * w_ref[e]
    scores_ref[...] = jnp.maximum(acc + b_ref[0], 0.0)


def _compute_relu_scores(table, w, b, v_pad):
    table_t = jnp.pad(table.T.astype(jnp.float32),
                      ((0, 0), (0, v_pad - table.shape[0])))        # (EMB, V_PAD)
    w_vec = w.reshape(EMB).astype(jnp.float32)                      # (EMB,)
    b_vec = b.reshape(1).astype(jnp.float32)                        # (1,)
    return pl.pallas_call(
        _scores_kernel,
        out_shape=jax.ShapeDtypeStruct((1, v_pad), jnp.float32),
        in_specs=[
            pl.BlockSpec(memory_space=pltpu.MemorySpace.VMEM),      # transposed table
            pl.BlockSpec(memory_space=pltpu.MemorySpace.SMEM),      # linear weight (4 scalars)
            pl.BlockSpec(memory_space=pltpu.MemorySpace.SMEM),      # linear bias scalar
        ],
        out_specs=pl.BlockSpec(memory_space=pltpu.MemorySpace.VMEM),
    )(table_t, w_vec, b_vec)


# ---------------------------------------------------------------------------
# Kernel 2 (gridded over batch tiles):  out[b] = sum_s relu_scores[idx[b, s]]
# 2-D one-hot counts (B_TILE, V_PAD) built with S VPU compares, then a VPU
# multiply against the broadcast (1, V_PAD) score row and a lane-axis reduce.
# No MXU, no 3-D intermediate; everything stays f32 (v5e-safe).
# ---------------------------------------------------------------------------
def _gather_sum_kernel(idx_ref, scores_ref, out_ref):
    b_tile, seq = idx_ref.shape
    v_pad = scores_ref.shape[1]

    idx = idx_ref[...]                                              # (B_TILE, S) int32
    scores = scores_ref[...]                                        # (1, V_PAD) f32

    # Hoisted iota (built once, reused across the static S loop).
    vocab_iota = jax.lax.broadcasted_iota(jnp.int32, (b_tile, v_pad), 1)
    counts = jnp.zeros((b_tile, v_pad), jnp.float32)
    for s in range(seq):                                            # S is small & static
        counts = counts + (idx[:, s:s + 1] == vocab_iota).astype(jnp.float32)

    # out[b] = sum_v counts[b, v] * relu_scores[v]   (VPU mul + lane reduce)
    out_ref[...] = jnp.sum(counts * scores, axis=-1, keepdims=True)  # (B_TILE, 1)


def simple_model_forward(idx, table, w, b):
    """idx: (B, S) int ids; table: (VOCAB, EMB) f32 (Embedding.weight);
    w: (1, EMB) f32 (Linear.weight); b: (1,) f32 (Linear.bias). Returns (B,) f32."""
    B, S = idx.shape
    v_pad = _round_up(VOCAB, LANE)

    # Precompute the per-vocab relu scores once (depends only on weights).
    relu_scores = _compute_relu_scores(table, w, b, v_pad)          # (1, V_PAD)

    # Batch tiling: sublane-aligned; per-step one-hot working set is
    # B_TILE * V_PAD * 4 B (<= 256*1536*4 = 1.5 MiB), comfortably inside the
    # 32 MiB scoped-VMEM limit set below (and v7x's 64 MiB physical VMEM).
    b_tile = 256 if B >= 256 else _round_up(B, 8)
    b_pad = _round_up(B, b_tile)
    idx_pad = jnp.pad(idx.astype(jnp.int32), ((0, b_pad - B), (0, 0)))

    out = pl.pallas_call(
        _gather_sum_kernel,
        out_shape=jax.ShapeDtypeStruct((b_pad, 1), jnp.float32),
        grid=(b_pad // b_tile,),
        in_specs=[
            pl.BlockSpec((b_tile, S), lambda i: (i, 0)),            # idx tile (auto double-buffered)
            pl.BlockSpec((1, v_pad), lambda i: (0, 0)),             # score row resident across grid
        ],
        out_specs=pl.BlockSpec((b_tile, 1), lambda i: (i, 0)),
        compiler_params=pltpu.CompilerParams(
            dimension_semantics=("parallel",),                      # batch axis -> 2 TCs on v7x
            vmem_limit_bytes=32 * 1024 * 1024,
        ),
    )(idx_pad, relu_scores)

    return out[:B, 0]                                               # (B,)


def reference_forward(idx, table, w, b):
    emb = table[idx]                                                # (B, S, EMB)
    y = emb @ w.reshape(EMB, 1) + b.reshape(())                     # (B, S, 1)
    y = jnp.maximum(y, 0.0)
    return y.sum(axis=(1, 2))                                       # (B,)


if __name__ == "__main__":
    key = jax.random.PRNGKey(0)
    k_idx, k_emb, k_w, k_b = jax.random.split(key, 4)

    B, S = 2, 8
    idx = jax.random.randint(k_idx, (B, S), 0, VOCAB, dtype=jnp.int32)

    # Deterministic synthetic parameters (shapes match the torch module).
    table = jax.random.normal(k_emb, (VOCAB, EMB), dtype=jnp.float32)            # Embedding.weight
    w = jax.random.normal(k_w, (1, EMB), dtype=jnp.float32) * 0.5                # Linear.weight (1, 4)
    b = jax.random.uniform(k_b, (1,), dtype=jnp.float32, minval=-0.5, maxval=0.5)  # Linear.bias (1,)

    out = jax.block_until_ready(simple_model_forward(idx, table, w, b))
    ref = reference_forward(idx, table, w, b)

    assert out.shape == (B,)
    assert jnp.allclose(out, ref, rtol=1e-5, atol=1e-5), (out, ref)

    print("KERNEL_OK")
</pallas_src>

<mosaic_0001>
module attributes {stable_mosaic.version = 11 : i64} {
  func.func @_scores_kernel(%arg0: memref<4x1536xf32, #tpu.memory_space<vmem>>, %arg1: memref<4xf32, #tpu.memory_space<smem>>, %arg2: memref<1xf32, #tpu.memory_space<smem>>, %arg3: memref<1x1536xf32, #tpu.memory_space<vmem>>) attributes {dimension_semantics = [], scalar_prefetch = 0 : i64, scratch_operands = 0 : i64, tpu.core_type = #tpu.core_type<tc>} {
    %c0 = arith.constant 0 : index
    %c0_0 = arith.constant 0 : index
    %0 = vector.load %arg0[%c0, %c0_0] : memref<4x1536xf32, #tpu.memory_space<vmem>>, vector<4x1536xf32>
    %1 = vector.extract_strided_slice %0 {offsets = [0, 0], sizes = [1, 1536], strides = [1, 1]} : vector<4x1536xf32> to vector<1x1536xf32>
    %c0_1 = arith.constant 0 : index
    %2 = memref.load %arg1[%c0_1] : memref<4xf32, #tpu.memory_space<smem>>
    %3 = vector.broadcast %2 : f32 to vector<1x1536xf32>
    %4 = arith.mulf %1, %3 : vector<1x1536xf32>
    %5 = vector.extract_strided_slice %0 {offsets = [1, 0], sizes = [1, 1536], strides = [1, 1]} : vector<4x1536xf32> to vector<1x1536xf32>
    %c1 = arith.constant 1 : index
    %6 = memref.load %arg1[%c1] : memref<4xf32, #tpu.memory_space<smem>>
    %7 = vector.broadcast %6 : f32 to vector<1x1536xf32>
    %8 = arith.mulf %5, %7 : vector<1x1536xf32>
    %9 = arith.addf %4, %8 : vector<1x1536xf32>
    %10 = vector.extract_strided_slice %0 {offsets = [2, 0], sizes = [1, 1536], strides = [1, 1]} : vector<4x1536xf32> to vector<1x1536xf32>
    %c2 = arith.constant 2 : index
    %11 = memref.load %arg1[%c2] : memref<4xf32, #tpu.memory_space<smem>>
    %12 = vector.broadcast %11 : f32 to vector<1x1536xf32>
    %13 = arith.mulf %10, %12 : vector<1x1536xf32>
    %14 = arith.addf %9, %13 : vector<1x1536xf32>
    %15 = vector.extract_strided_slice %0 {offsets = [3, 0], sizes = [1, 1536], strides = [1, 1]} : vector<4x1536xf32> to vector<1x1536xf32>
    %c3 = arith.constant 3 : index
    %16 = memref.load %arg1[%c3] : memref<4xf32, #tpu.memory_space<smem>>
    %17 = vector.broadcast %16 : f32 to vector<1x1536xf32>
    %18 = arith.mulf %15, %17 : vector<1x1536xf32>
    %19 = arith.addf %14, %18 : vector<1x1536xf32>
    %c0_2 = arith.constant 0 : index
    %20 = memref.load %arg2[%c0_2] : memref<1xf32, #tpu.memory_space<smem>>
    %21 = vector.broadcast %20 : f32 to vector<1x1536xf32>
    %22 = arith.addf %19, %21 : vector<1x1536xf32>
    %cst = arith.constant 0.000000e+00 : f32
    %23 = vector.broadcast %cst : f32 to vector<1x1536xf32>
    %24 = arith.maximumf %22, %23 : vector<1x1536xf32>
    %c0_3 = arith.constant 0 : index
    %c0_4 = arith.constant 0 : index
    %25 = vector.load %arg3[%c0_3, %c0_4] : memref<1x1536xf32, #tpu.memory_space<vmem>>, vector<1x1536xf32>
    tpu.vector_store %arg3[%c0_3, %c0_4], %24 {strides = array<i32>} : memref<1x1536xf32, #tpu.memory_space<vmem>>, vector<1x1536xf32>,
    return
  }
}

</mosaic_0001>

<bundles_post_ra>
// kernel: tpu_custom_call.1
= control target key start
LH: loop header
LB: loop body
LE: loop exit
PB: predicated region body
PF: predicated region fallthrough
CT: control target
= control target key end

     0   :  { %9 = vsyncpa [#allocation4], 0  ;;  %s450_s0 = inlined_call_operand.hbm [shape: f32[4,1536], index: 0, kind: input, shape index: {}]   ;;  %s451_s1 = inlined_call_operand.vmem [shape: f32[4], index: 1, kind: input, shape index: {}]   ;;  %s452_s2 = inlined_call_operand.<no memory space> [shape: f32[1], index: 2, kind: input, shape index: {}]   ;;  %s453_s3 = inlined_call_operand.hbm [shape: f32[1,1536], index: 3, kind: output, shape index: {}]  }
   0x1   :  { %10 = vsyncpa [#allocation6], 0 }
   0x2   :  { %11 = vsyncpa [#allocation5], 0  ;;  %s28_s14 = sshll.u32 %s451_s1, 4  ;;  %s367_s15 = smov [#allocation3]   ;;  %s29_s14 = int_to_ptr.vmem [resolvable:$true] %s28_s14 }
   0x3   :  { %s18_s16 = sshll.u32 %s367_s15, 4  ;;  %s305_s19 = scalar_lea.hbm %s450_s0, 768  ;;  %s19_s16 = int_to_ptr.vmem [resolvable:$true] %s18_s16 }
   0x4   :  { %p306_p0 = scmp.ne.s32.totalorder %s450_s0, %s305_s19  ;;  %p309_p1 = scmp.lt.u32.totalorder %s305_s19, %s450_s0 }
   0x6   :  { %p311_p2 = pnand %p309_p1, %p306_p0 }
   0x8   :  { %314 = shalt.err (!%p311_p2)
}
   0x9   :  { %s315_s24 = scalar_lea.vmem %s19_s16, 768  ;;  %p320_p4 = scmp.lt.s32.totalorder %s19_s16, %s19_s16 }
   0xa   :  { %p316_p3 = scmp.ne.s32.totalorder %s19_s16, %s315_s24  ;;  %p321_p5 = scmp.lt.s32.totalorder %s315_s24, %s315_s24 }
   0xc   :  { %p322_p6 = por %p321_p5, %p320_p4 }
   0xe   :  { %p323_p7 = pnand %p322_p6, %p316_p3 }
  0x10   :  { %326 = shalt.err (!%p323_p7)
}
  0x11   :  { %21 = dma.hbm_to_vmem [thread:$0]  %s450_s0, 768, %s19_s16, [#allocation4]  }
  0x12   :  { %s327_s26 = scalar_lea.vmem %s29_s14, 16  ;;  %p332_p9 = scmp.lt.s32.totalorder %s29_s14, %s29_s14 }
  0x13   :  { %p328_p8 = scmp.ne.s32.totalorder %s29_s14, %s327_s26  ;;  %p333_p10 = scmp.lt.s32.totalorder %s327_s26, %s327_s26 }
  0x15   :  { %p334_p11 = por %p333_p10, %p332_p9 }
  0x17   :  { %p335_p12 = pnand %p334_p11, %p328_p8 }
  0x19   :  { %338 = shalt.err (!%p335_p12)
}
  0x1a   :  { %s368_s27 = smov [#allocation7]  }
  0x1b   :  { %31 = dma.vmem_to_smem %s29_s14, 16, %s368_s27, [#allocation6]  }
  0x1c   :  { %361 = dma.done.wait [#allocation4], 768  }
  0x1d   :  { %362 = vsyncadd [#allocation4], 4294966528 }
  0x1e   :  { %363 = dma.done.wait [#allocation6], 16  }
  0x1f   :  { %364 = vsyncadd [#allocation6], 4294967280 }
  0x20   :  { %40 = sfence }
  0x21   :  { %s47_s28 = sld [smem:[#allocation7]]  ;;  %v192_v0 = vlaneseq  ;;  %s280_s29 = sld [smem:[#allocation7 + $0x1]]  ;;  %v369_v1 = vmov 1966171168   ;;  %v41_v4 = vld [vmem:[#allocation3] sm:$0xff]  ;;  %v42_v6 = vld [vmem:[#allocation3 + $0x8] sm:$0xff]  ;;  %v410_v10 = vstv %s452_s2 }
  0x22   :  { %s287_s30 = sld [smem:[#allocation7 + $0x2]]  ;;  %s294_s4 = sld [smem:[#allocation7 + $0x3]]  ;;  %v190_v2 = vunpack.c.l.s4 %v369_v1  ;;  %v43_v7 = vld [vmem:[#allocation3 + $0x10] sm:$0xff]  ;;  %v44_v8 = vld [vmem:[#allocation3 + $0x18] sm:$0xff]  ;;  %v45_v43 = vld [vmem:[#allocation3 + $0x20] sm:$0xff] }
  0x23   :  { %v193_v3 = vshrl.u32 %v192_v0, 7  ;;  %v46_v44 = vld [vmem:[#allocation3 + $0x28] sm:$0xff]  ;;  %s370_s2 = smov [#allocation8]   ;;  %vm261_vm0 = vcmp.lt.s32.totalorder %v192_v0, 512 }
  0x24   :  { %v191_v5 = vunpack.c.0.s8 %v190_v2  ;;  %s270_s6 = sshll.u32 %s370_s2, 4  ;;  %s271_s6 = int_to_ptr.vmem [resolvable:$true] %s270_s6 }
  0x25   :  { %s339_s7 = scalar_lea.vmem %s271_s6, 192  ;;  %p344_p0 = scmp.lt.s32.totalorder %s271_s6, %s271_s6 }
  0x26   :  { %v414_v18 = vsub.s32 %v191_v5, %v193_v3  ;;  %p340_p13 = scmp.ne.s32.totalorder %s271_s6, %s339_s7  ;;  %p345_p1 = scmp.lt.s32.totalorder %s339_s7, %s339_s7 }
  0x27   :  { %v48_v9 = vstv %s47_s28  ;;  %v56_v15 = vstv %s280_s29 }
  0x28   :  { %v49_v11 = vmul.f32 %v48_v9, %v41_v4  ;;  %v50_v12 = vmul.f32 %v48_v9, %v42_v6  ;;  %v51_v13 = vmul.f32 %v48_v9, %v43_v7  ;;  %v52_v14 = vmul.f32 %v48_v9, %v44_v8  ;;  %p346_p2 = por %p345_p1, %p344_p0 }
  0x29   :  { %v94_v16 = vstv %s287_s30  ;;  %v412_v17 = vstv %s294_s4  ;;  %v57_v19 = vmul.f32 %v56_v15, %v41_v4  ;;  %v58_v20 = vmul.f32 %v56_v15, %v42_v6 }
  0x2a   :  { %v59_v21 = vmul.f32 %v56_v15, %v43_v7  ;;  %v60_v22 = vmul.f32 %v56_v15, %v44_v8  ;;  %v95_v23 = vmul.f32 %v94_v16, %v41_v4  ;;  %v96_v24 = vmul.f32 %v94_v16, %v42_v6  ;;  %p347_p3 = pnand %p346_p2, %p340_p13 }
  0x2b   :  { %v97_v25 = vmul.f32 %v94_v16, %v43_v7  ;;  %v98_v26 = vmul.f32 %v94_v16, %v44_v8  ;;  %v281_v27 = vrot.slane %v57_v19, 9  ;;  %v282_v28 = vrot.slane %v58_v20, 9 }
  0x2c   :  { %v283_v29 = vrot.slane %v59_v21, 9  ;;  %v284_v30 = vrot.slane %v60_v22, 9  ;;  %v288_v31 = vrot.slane %v95_v23, 10  ;;  %v289_v32 = vrot.slane %v96_v24, 10 }
  0x2d   :  { %v290_v33 = vrot.slane %v97_v25, 10  ;;  %v291_v34 = vrot.slane %v98_v26, 10  ;;  %v87_v35 = vadd.f32 %v281_v27, %v49_v11  ;;  %v88_v36 = vadd.f32 %v282_v28, %v50_v12 }
  0x2e   :  { %v89_v37 = vadd.f32 %v283_v29, %v51_v13  ;;  %v90_v38 = vadd.f32 %v284_v30, %v52_v14  ;;  %v133_v39 = vmul.f32 %v412_v17, %v41_v4  ;;  %v134_v40 = vmul.f32 %v412_v17, %v42_v6 }
  0x2f   :  { %v135_v41 = vmul.f32 %v412_v17, %v43_v7  ;;  %v136_v42 = vmul.f32 %v412_v17, %v44_v8  ;;  %v125_v45 = vadd.f32 %v288_v31, %v87_v35  ;;  %v126_v46 = vadd.f32 %v289_v32, %v88_v36 }
  0x30   :  { %v127_v47 = vadd.f32 %v290_v33, %v89_v37  ;;  %v128_v48 = vadd.f32 %v291_v34, %v90_v38  ;;  %v295_v49 = vrot.slane %v133_v39, 11  ;;  %v296_v50 = vrot.slane %v134_v40, 11 }
  0x31   :  { %v297_v51 = vrot.slane %v135_v41, 11  ;;  %v298_v52 = vrot.slane %v136_v42, 11  ;;  %v53_v53 = vmul.f32 %v48_v9, %v45_v43  ;;  %v54_v54 = vmul.f32 %v48_v9, %v46_v44 }
  0x32   :  { %v61_v55 = vmul.f32 %v56_v15, %v45_v43  ;;  %v62_v56 = vmul.f32 %v56_v15, %v46_v44  ;;  %v163_v57 = vadd.f32 %v295_v49, %v125_v45  ;;  %v164_v58 = vadd.f32 %v296_v50, %v126_v46 }
  0x33   :  { %v165_v59 = vadd.f32 %v297_v51, %v127_v47  ;;  %v166_v60 = vadd.f32 %v298_v52, %v128_v48  ;;  %v99_v63 = vmul.f32 %v94_v16, %v45_v43  ;;  %v100_v1 = vmul.f32 %v94_v16, %v46_v44 }
  0x34   :  { %v285_v61 = vrot.slane %v61_v55, 9  ;;  %v286_v62 = vrot.slane %v62_v56, 9  ;;  %v171_v2 = vadd.f32 %v410_v10, %v163_v57  ;;  %v172_v3 = vadd.f32 %v410_v10, %v164_v58 }
  0x35   :  { %v173_v4 = vadd.f32 %v410_v10, %v165_v59  ;;  %v174_v5 = vadd.f32 %v410_v10, %v166_v60  ;;  %v292_v8 = vrot.slane %v99_v63, 10  ;;  %v293_v9 = vrot.slane %v100_v1, 10 }
  0x36   :  { %v91_v6 = vadd.f32 %v285_v61, %v53_v53  ;;  %v92_v7 = vadd.f32 %v286_v62, %v54_v54  ;;  %v177_v11 = vmax.f32 %v171_v2, 0.0  ;;  %v178_v12 = vmax.f32 %v172_v3, 0.0 }
  0x37   :  { %v179_v13 = vmax.f32 %v173_v4, 0.0  ;;  %v180_v14 = vmax.f32 %v174_v5, 0.0  ;;  %v137_v16 = vmul.f32 %v412_v17, %v45_v43  ;;  %v138_v20 = vmul.f32 %v412_v17, %v46_v44 }
  0x38   :  { %v129_v15 = vadd.f32 %v292_v8, %v91_v6  ;;  %v130_v19 = vadd.f32 %v293_v9, %v92_v7  ;;  %v195_v21 = vrot.slane %v177_v11, %v414_v18  ;;  %v202_v22 = vrot.slane %v178_v12, %v414_v18 }
  0x39   :  { %v209_v23 = vrot.slane %v179_v13, %v414_v18  ;;  %v216_v24 = vrot.slane %v180_v14, %v414_v18  ;;  %v299_v25 = vrot.slane %v137_v16, 11  ;;  %v300_v26 = vrot.slane %v138_v20, 11 }
  0x3a   :  { %v217_v27 = vcombine.low %v195_v21, %v202_v22 }
  0x3b   :  { %v218_v28 = vcombine.low %v209_v23, %v216_v24  ;;  %v167_v29 = vadd.f32 %v299_v25, %v129_v15  ;;  %v168_v30 = vadd.f32 %v300_v26, %v130_v19 }
  0x3c   :  { %v225_v31 = vrot.slane %v217_v27, %v414_v18 }
  0x3d   :  { %v232_v32 = vrot.slane %v218_v28, %v414_v18  ;;  %v175_v17 = vadd.f32 %v410_v10, %v167_v29  ;;  %v176_v33 = vadd.f32 %v410_v10, %v168_v30 }
  0x3f   :  { %v233_v34 = vcombine.low %v225_v31, %v232_v32  ;;  %v181_v35 = vmax.f32 %v175_v17, 0.0  ;;  %v182_v36 = vmax.f32 %v176_v33, 0.0 }
  0x41   :  { %258 = vst [vmem:[#allocation8] sm:$0xff] %v233_v34  ;;  %v240_v37 = vrot.slane %v181_v35, %v414_v18  ;;  %v247_v38 = vrot.slane %v182_v36, %v414_v18 }
  0x43   :  { %v248_v39 = vcombine.low %v240_v37, %v247_v38 }
  0x45   :  { %v255_v40 = vrot.slane %v248_v39, %v414_v18 }
  0x47   :  { %263 = vst.msk [vmem:[#allocation8 + $0x8] sm:$0xf] %vm261_vm0, %v255_v40 }
  0x48   :  { %350 = shalt.err (!%p347_p3)
}
  0x49   :  { %s351_s10 = scalar_lea.hbm %s453_s3, 192 }
  0x4a   :  { %p352_p4 = scmp.ne.s32.totalorder %s453_s3, %s351_s10  ;;  %p355_p5 = scmp.lt.u32.totalorder %s351_s10, %s453_s3 }
  0x4c   :  { %p357_p6 = pnand %p355_p5, %p352_p4 }
  0x4e   :  { %360 = shalt.err (!%p357_p6)
}
  0x4f   :  { %273 = dma.vmem_to_hbm [thread:$0]  %s271_s6, 192, %s453_s3, [#allocation5]  }
  0x50   :  { %365 = dma.done.wait [#allocation5], 192  }
  0x51   :  { %366 = vsyncadd [#allocation5], 4294967104 }
  0x52   :  { %277 = vsyncpa [#allocation4], 1 }
  0x53   :  { %278 = vsyncpa [#allocation5], 1 }
  0x54   :  { %279 = vsyncpa [#allocation6], 1 }

</bundles_post_ra>
